<compile_context>
chip_gen: v7x
topology: tpu7x:2x2x1
jax: 0.10.0
libtpu: 0.0.40
codegen_flags: <defaults>
</compile_context>

<pallas_src>
import jax
import jax.numpy as jnp
from jax.experimental import pallas as pl
from jax.experimental.pallas import tpu as pltpu


def _round_up(n, m):
    return ((n + m - 1) // m) * m


def contrastive_kernel(x_ref, wb_ref, bb_ref, w1_ref, b1_ref, w2_ref, b2_ref,
                       feat_ref, out_ref, acc_ref):
    k = pl.program_id(1)

    @pl.when(k == 0)
    def _():
        acc_ref[...] = jnp.zeros_like(acc_ref)

    # ---- backbone matmul, K-tiled: acc += x_k @ Wb_k  (bf16 MXU in, f32 accumulate) ----
    acc_ref[...] += jnp.dot(x_ref[...].astype(jnp.bfloat16), wb_ref[...],
                            preferred_element_type=jnp.float32)

    @pl.when(k == pl.num_programs(1) - 1)
    def _():
        # backbone epilogue: bias + ReLU (f32)
        feat = jnp.maximum(acc_ref[...] + bb_ref[...], 0.0)        # (TB, D1p) f32
        feat_ref[...] = feat                                        # lane-dense store

        # ---- contrastive head (mlp): Linear -> ReLU -> Linear ----
        h = jnp.dot(feat.astype(jnp.bfloat16), w1_ref[...],
                    preferred_element_type=jnp.float32) + b1_ref[...]
        h = jnp.maximum(h, 0.0)                                     # (TB, D2p) f32
        o = jnp.dot(h.astype(jnp.bfloat16), w2_ref[...],
                    preferred_element_type=jnp.float32) + b2_ref[...]  # (TB, Fp) f32

        # F.normalize(out, dim=-1): o / max(||o||, 1e-12) == o * rsqrt(max(sumsq, 1e-24))
        sumsq = jnp.sum(o * o, axis=-1, keepdims=True)
        out_ref[...] = o * jax.lax.rsqrt(jnp.maximum(sumsq, 1e-24))


def prepare_params(params):
    """One-time weight padding + bf16 cast (hoisted out of the per-call hot path)."""
    wb, bb = params["wb"], params["bb"]
    w1, b1 = params["w1"], params["b1"]
    w2, b2 = params["w2"], params["b2"]
    K, D1 = wb.shape
    D2, F_dim = w1.shape[1], w2.shape[1]
    Kp, D1p, D2p, Fp = (_round_up(d, 128) for d in (K, D1, D2, F_dim))

    def pad2(a, r, c):
        return jnp.pad(a, ((0, r - a.shape[0]), (0, c - a.shape[1])))

    return {
        "wb": pad2(wb, Kp, D1p).astype(jnp.bfloat16),
        "bb": pad2(bb, 1, D1p).astype(jnp.float32),
        "w1": pad2(w1, D1p, D2p).astype(jnp.bfloat16),
        "b1": pad2(b1, 1, D2p).astype(jnp.float32),
        "w2": pad2(w2, D2p, Fp).astype(jnp.bfloat16),
        "b2": pad2(b2, 1, Fp).astype(jnp.float32),
        "dims": (K, D1, D2, F_dim),
        "pdims": (Kp, D1p, D2p, Fp),
    }


def contrastive_model(x, i, prepared, *, batch_tile=256):
    """x: (B, C, H, W) float32 (flattened inside); i: unused backbone index arg."""
    del i  # synthetic backbone ignores the index argument
    K, D1, D2, F_dim = prepared["dims"]
    Kp, D1p, D2p, Fp = prepared["pdims"]

    B = x.shape[0]
    x_flat = x.reshape(B, -1).astype(jnp.float32)
    assert x_flat.shape[1] == K

    # Batch tile: multiple of 16 (bf16 sublane packing), capped at batch_tile, and the
    # grid gets >= 2 batch blocks so the "parallel" axis can shard across v7x's 2 TCs.
    B16 = _round_up(B, 16)
    TB = min(batch_tile, _round_up(pl.cdiv(B16, 2), 16))
    Bp = _round_up(B16, TB)
    if Bp // TB < 2:
        Bp = 2 * TB

    # K tile: largest of 512/256/128 that divides Kp (Kp is always a 128-multiple).
    if Kp % 512 == 0:
        TK = 512
    elif Kp % 256 == 0:
        TK = 256
    else:
        TK = 128

    # Pad x only if needed. Unpadded f32 x is cast to bf16 inside the kernel (cheaper HBM
    # path); when padding forces a copy anyway, cast to bf16 in the wrapper.
    if (Bp != B) or (Kp != K):
        x_in = jnp.pad(x_flat, ((0, Bp - B), (0, Kp - K))).astype(jnp.bfloat16)
    else:
        x_in = x_flat

    grid = (Bp // TB, Kp // TK)

    const = pl.Buffered(1)  # constant-index blocks: no point double-buffering them
    in_specs = [
        pl.BlockSpec((TB, TK), lambda b, k: (b, k)),                     # x (streamed)
        pl.BlockSpec((TK, D1p), lambda b, k: (k, 0)),                    # Wb (K-tiled)
        pl.BlockSpec((1, D1p), lambda b, k: (0, 0), pipeline_mode=const),
        pl.BlockSpec((D1p, D2p), lambda b, k: (0, 0), pipeline_mode=const),
        pl.BlockSpec((1, D2p), lambda b, k: (0, 0), pipeline_mode=const),
        pl.BlockSpec((D2p, Fp), lambda b, k: (0, 0), pipeline_mode=const),
        pl.BlockSpec((1, Fp), lambda b, k: (0, 0), pipeline_mode=const),
    ]
    out_specs = (
        pl.BlockSpec((TB, D1p), lambda b, k: (b, 0)),
        pl.BlockSpec((TB, Fp), lambda b, k: (b, 0)),
    )

    x_item = 2 if x_in.dtype == jnp.bfloat16 else 4
    vmem_bytes = (
        2 * TB * TK * x_item            # x tile, double-buffered
        + 2 * TK * D1p * 2              # backbone weight tile (bf16), double-buffered
        + (D1p * D2p + D2p * Fp) * 2    # resident head weights (single-buffered)
        + (D1p + D2p + Fp) * 4          # biases
        + 2 * TB * (D1p + Fp) * 4       # output tiles, double-buffered
        + TB * D1p * 4                  # f32 accumulator scratch
    )
    # Floor 32 MiB (>= every chip's scoped default headroom), cap 64 MiB (v7x physical).
    vmem_limit = max(min(int(1.5 * vmem_bytes) + (2 << 20), 64 << 20), 32 << 20)

    flops = 2 * Bp * (Kp * D1p + D1p * D2p + D2p * Fp)
    bytes_accessed = (x_in.size * x_item
                      + (Kp * D1p + D1p * D2p + D2p * Fp) * 2
                      + (D1p + D2p + Fp) * 4
                      + Bp * (D1p + Fp) * 4)

    feat_p, out_p = pl.pallas_call(
        contrastive_kernel,
        out_shape=(
            jax.ShapeDtypeStruct((Bp, D1p), jnp.float32),   # padded features
            jax.ShapeDtypeStruct((Bp, Fp), jnp.float32),    # padded normalized output
        ),
        grid=grid,
        in_specs=in_specs,
        out_specs=out_specs,
        scratch_shapes=[pltpu.VMEM((TB, D1p), jnp.float32)],
        compiler_params=pltpu.CompilerParams(
            dimension_semantics=("parallel", "arbitrary"),
            vmem_limit_bytes=vmem_limit),
        cost_estimate=pl.CostEstimate(
            flops=flops, transcendentals=Bp, bytes_accessed=bytes_accessed),
    )(x_in, prepared["wb"], prepared["bb"], prepared["w1"], prepared["b1"],
      prepared["w2"], prepared["b2"])

    # Un-pad to the module's semantics: features (B, backbone_dim), out (B, features_dim).
    return feat_p[:B, :D1], out_p[:B, :F_dim]


def init_params(key, in_dim, backbone_dim, backbone_dim2, features_dim):
    ks = jax.random.split(key, 6)
    scale = 0.02
    return {
        "wb": scale * jax.random.normal(ks[0], (in_dim, backbone_dim), jnp.float32),
        "bb": scale * jax.random.normal(ks[1], (1, backbone_dim), jnp.float32),
        "w1": scale * jax.random.normal(ks[2], (backbone_dim, backbone_dim2), jnp.float32),
        "b1": scale * jax.random.normal(ks[3], (1, backbone_dim2), jnp.float32),
        "w2": scale * jax.random.normal(ks[4], (backbone_dim2, features_dim), jnp.float32),
        "b2": scale * jax.random.normal(ks[5], (1, features_dim), jnp.float32),
    }


if __name__ == "__main__":
    key = jax.random.PRNGKey(0)
    k_x, k_p = jax.random.split(key)

    # Small shapes consistent with the forward: NCHW input, mlp head, features_dim=128.
    B, C, H, W = 2, 4, 16, 16
    backbone_dim, backbone_dim2, features_dim = 64, 32, 128

    x = jax.random.normal(k_x, (B, C, H, W), jnp.float32)
    i = jnp.zeros((B,), jnp.int32)  # index argument of backbone(x, i) — unused here
    params = init_params(k_p, C * H * W, backbone_dim, backbone_dim2, features_dim)
    prepared = prepare_params(params)   # one-time pad + bf16 cast (hoisted out of hot path)

    feat, out = contrastive_model(x, i, prepared)
    jax.block_until_ready((feat, out))

    # Reference mirroring the kernel's bf16 MXU inputs / f32 accumulation.
    def bf(a):
        return a.astype(jnp.bfloat16).astype(jnp.float32)

    x_flat = x.reshape(B, -1)
    feat_ref = jnp.maximum(bf(x_flat) @ bf(params["wb"]) + params["bb"], 0.0)
    h_ref = jnp.maximum(bf(feat_ref) @ bf(params["w1"]) + params["b1"], 0.0)
    o_ref = bf(h_ref) @ bf(params["w2"]) + params["b2"]
    o_ref = o_ref / jnp.maximum(
        jnp.sqrt(jnp.sum(o_ref * o_ref, axis=-1, keepdims=True)), 1e-12)

    assert feat.shape == (B, backbone_dim) and out.shape == (B, features_dim)
    assert jnp.allclose(feat, feat_ref, atol=2e-3, rtol=2e-3)
    assert jnp.allclose(out, o_ref, atol=2e-3, rtol=2e-3)
    assert jnp.allclose(jnp.linalg.norm(out, axis=-1), 1.0, atol=1e-3)

    print("KERNEL_OK")
</pallas_src>

<mosaic_0001>
module attributes {stable_mosaic.version = 11 : i64} {
  func.func @contrastive_kernel(%arg0: i32, %arg1: i32, %arg2: memref<16x512xbf16, #tpu.memory_space<vmem>>, %arg3: memref<512x128xbf16, #tpu.memory_space<vmem>>, %arg4: memref<1x128xf32, #tpu.memory_space<vmem>>, %arg5: memref<128x128xbf16, #tpu.memory_space<vmem>>, %arg6: memref<1x128xf32, #tpu.memory_space<vmem>>, %arg7: memref<128x128xbf16, #tpu.memory_space<vmem>>, %arg8: memref<1x128xf32, #tpu.memory_space<vmem>>, %arg9: memref<16x128xf32, #tpu.memory_space<vmem>>, %arg10: memref<16x128xf32, #tpu.memory_space<vmem>>, %arg11: memref<16x128xf32, #tpu.memory_space<vmem>>) attributes {dimension_semantics = [#tpu.dimension_semantics<parallel>, #tpu.dimension_semantics<arbitrary>], iteration_bounds = array<i64: 2, 2>, scalar_prefetch = 0 : i64, scratch_operands = 1 : i64, tpu.core_type = #tpu.core_type<tc>, window_params = [{transform_indices = @transform_0, window_bounds = array<i64: 16, 512>}, {transform_indices = @transform_1, window_bounds = array<i64: 512, 128>}, {pipeline_mode = #tpu.pipeline_mode<synchronous>, transform_indices = @transform_2, window_bounds = array<i64: 1, 128>}, {pipeline_mode = #tpu.pipeline_mode<synchronous>, transform_indices = @transform_3, window_bounds = array<i64: 128, 128>}, {pipeline_mode = #tpu.pipeline_mode<synchronous>, transform_indices = @transform_4, window_bounds = array<i64: 1, 128>}, {pipeline_mode = #tpu.pipeline_mode<synchronous>, transform_indices = @transform_5, window_bounds = array<i64: 128, 128>}, {pipeline_mode = #tpu.pipeline_mode<synchronous>, transform_indices = @transform_6, window_bounds = array<i64: 1, 128>}, {transform_indices = @transform_7, window_bounds = array<i64: 16, 128>}, {transform_indices = @transform_8, window_bounds = array<i64: 16, 128>}]} {
    %c0_i32 = arith.constant 0 : i32
    %0 = arith.cmpi eq, %arg1, %c0_i32 : i32
    %1 = arith.extui %0 : i1 to i32
    %c0_i32_0 = arith.constant 0 : i32
    %2 = arith.cmpi ne, %1, %c0_i32_0 : i32
    scf.if %2 {
      %cst_9 = arith.constant 0.000000e+00 : f32
      %12 = vector.broadcast %cst_9 : f32 to vector<16x128xf32>
      %c0_10 = arith.constant 0 : index
      %c0_11 = arith.constant 0 : index
      %13 = vector.load %arg11[%c0_10, %c0_11] : memref<16x128xf32, #tpu.memory_space<vmem>>, vector<16x128xf32>
      tpu.vector_store %arg11[%c0_10, %c0_11], %12 {strides = array<i32>} : memref<16x128xf32, #tpu.memory_space<vmem>>, vector<16x128xf32>,
    } else {
    }
    %c0 = arith.constant 0 : index
    %c0_1 = arith.constant 0 : index
    %3 = vector.load %arg11[%c0, %c0_1] : memref<16x128xf32, #tpu.memory_space<vmem>>, vector<16x128xf32>
    %c0_2 = arith.constant 0 : index
    %c0_3 = arith.constant 0 : index
    %4 = vector.load %arg2[%c0_2, %c0_3] : memref<16x512xbf16, #tpu.memory_space<vmem>>, vector<16x512xbf16>
    %c0_4 = arith.constant 0 : index
    %c0_5 = arith.constant 0 : index
    %5 = vector.load %arg3[%c0_4, %c0_5] : memref<512x128xbf16, #tpu.memory_space<vmem>>, vector<512x128xbf16>
    %cst = arith.constant dense<0.000000e+00> : vector<16x128xf32>
    %6 = tpu.matmul %4, %5, %cst {dimension_numbers = #tpu.dot_dimension_numbers<[1], [0], [0], [1], [0, 0, 1, 1], [], []>} : vector<16x512xbf16>, vector<512x128xbf16>, vector<16x128xf32> -> vector<16x128xf32>
    %7 = arith.addf %3, %6 : vector<16x128xf32>
    %c0_6 = arith.constant 0 : index
    %c0_7 = arith.constant 0 : index
    %8 = vector.load %arg11[%c0_6, %c0_7] : memref<16x128xf32, #tpu.memory_space<vmem>>, vector<16x128xf32>
    tpu.vector_store %arg11[%c0_6, %c0_7], %7 {strides = array<i32>} : memref<16x128xf32, #tpu.memory_space<vmem>>, vector<16x128xf32>,
    %c1_i32 = arith.constant 1 : i32
    %9 = arith.cmpi eq, %arg1, %c1_i32 : i32
    %10 = arith.extui %9 : i1 to i32
    %c0_i32_8 = arith.constant 0 : i32
    %11 = arith.cmpi ne, %10, %c0_i32_8 : i32
    scf.if %11 {
      %c0_9 = arith.constant 0 : index
      %c0_10 = arith.constant 0 : index
      %12 = vector.load %arg11[%c0_9, %c0_10] : memref<16x128xf32, #tpu.memory_space<vmem>>, vector<16x128xf32>
      %c0_11 = arith.constant 0 : index
      %c0_12 = arith.constant 0 : index
      %13 = vector.load %arg4[%c0_11, %c0_12] : memref<1x128xf32, #tpu.memory_space<vmem>>, vector<1x128xf32>
      %14 = vector.broadcast %13 : vector<1x128xf32> to vector<16x128xf32>
      %15 = arith.addf %12, %14 : vector<16x128xf32>
      %cst_13 = arith.constant 0.000000e+00 : f32
      %16 = vector.broadcast %cst_13 : f32 to vector<16x128xf32>
      %17 = arith.maximumf %15, %16 : vector<16x128xf32>
      %c0_14 = arith.constant 0 : index
      %c0_15 = arith.constant 0 : index
      %18 = vector.load %arg9[%c0_14, %c0_15] : memref<16x128xf32, #tpu.memory_space<vmem>>, vector<16x128xf32>
      tpu.vector_store %arg9[%c0_14, %c0_15], %17 {strides = array<i32>} : memref<16x128xf32, #tpu.memory_space<vmem>>, vector<16x128xf32>,
      %19 = arith.truncf %17 : vector<16x128xf32> to vector<16x128xbf16>
      %c0_16 = arith.constant 0 : index
      %c0_17 = arith.constant 0 : index
      %20 = vector.load %arg5[%c0_16, %c0_17] : memref<128x128xbf16, #tpu.memory_space<vmem>>, vector<128x128xbf16>
      %cst_18 = arith.constant dense<0.000000e+00> : vector<16x128xf32>
      %21 = tpu.matmul %19, %20, %cst_18 {dimension_numbers = #tpu.dot_dimension_numbers<[1], [0], [0], [1], [0, 0, 1, 1], [], []>} : vector<16x128xbf16>, vector<128x128xbf16>, vector<16x128xf32> -> vector<16x128xf32>
      %c0_19 = arith.constant 0 : index
      %c0_20 = arith.constant 0 : index
      %22 = vector.load %arg6[%c0_19, %c0_20] : memref<1x128xf32, #tpu.memory_space<vmem>>, vector<1x128xf32>
      %23 = vector.broadcast %22 : vector<1x128xf32> to vector<16x128xf32>
      %24 = arith.addf %21, %23 : vector<16x128xf32>
      %cst_21 = arith.constant 0.000000e+00 : f32
      %25 = vector.broadcast %cst_21 : f32 to vector<16x128xf32>
      %26 = arith.maximumf %24, %25 : vector<16x128xf32>
      %27 = arith.truncf %26 : vector<16x128xf32> to vector<16x128xbf16>
      %c0_22 = arith.constant 0 : index
      %c0_23 = arith.constant 0 : index
      %28 = vector.load %arg7[%c0_22, %c0_23] : memref<128x128xbf16, #tpu.memory_space<vmem>>, vector<128x128xbf16>
      %cst_24 = arith.constant dense<0.000000e+00> : vector<16x128xf32>
      %29 = tpu.matmul %27, %28, %cst_24 {dimension_numbers = #tpu.dot_dimension_numbers<[1], [0], [0], [1], [0, 0, 1, 1], [], []>} : vector<16x128xbf16>, vector<128x128xbf16>, vector<16x128xf32> -> vector<16x128xf32>
      %c0_25 = arith.constant 0 : index
      %c0_26 = arith.constant 0 : index
      %30 = vector.load %arg8[%c0_25, %c0_26] : memref<1x128xf32, #tpu.memory_space<vmem>>, vector<1x128xf32>
      %31 = vector.broadcast %30 : vector<1x128xf32> to vector<16x128xf32>
      %32 = arith.addf %29, %31 : vector<16x128xf32>
      %33 = arith.mulf %32, %32 : vector<16x128xf32>
      %cst_27 = arith.constant dense<0.000000e+00> : vector<16xf32>
      %34 = vector.multi_reduction <add>, %33, %cst_27 [1] : vector<16x128xf32> to vector<16xf32>
      %35 = vector.shape_cast %34 : vector<16xf32> to vector<16x1xf32>
      %cst_28 = arith.constant 1.000000e-24 : f32
      %36 = vector.broadcast %cst_28 : f32 to vector<16x1xf32>
      %37 = arith.maximumf %35, %36 : vector<16x1xf32>
      %38 = math.rsqrt %37 : vector<16x1xf32>
      %39 = vector.broadcast %38 : vector<16x1xf32> to vector<16x128xf32>
      %40 = arith.mulf %32, %39 : vector<16x128xf32>
      %c0_29 = arith.constant 0 : index
      %c0_30 = arith.constant 0 : index
      %41 = vector.load %arg10[%c0_29, %c0_30] : memref<16x128xf32, #tpu.memory_space<vmem>>, vector<16x128xf32>
      tpu.vector_store %arg10[%c0_29, %c0_30], %40 {strides = array<i32>} : memref<16x128xf32, #tpu.memory_space<vmem>>, vector<16x128xf32>,
    } else {
    }
    return
  }
  func.func @transform_0(%arg0: i32, %arg1: i32) -> (i32, i32) {
    %c0_i32 = arith.constant 0 : i32
    return %arg0, %arg1 : i32, i32
  }
  func.func @transform_1(%arg0: i32, %arg1: i32) -> (i32, i32) {
    %c0_i32 = arith.constant 0 : i32
    %c0_i32_0 = arith.constant 0 : i32
    return %arg1, %c0_i32 : i32, i32
  }
  func.func @transform_2(%arg0: i32, %arg1: i32) -> (i32, i32) {
    %c0_i32 = arith.constant 0 : i32
    %c0_i32_0 = arith.constant 0 : i32
    %c0_i32_1 = arith.constant 0 : i32
    return %c0_i32, %c0_i32_0 : i32, i32
  }
  func.func @transform_3(%arg0: i32, %arg1: i32) -> (i32, i32) {
    %c0_i32 = arith.constant 0 : i32
    %c0_i32_0 = arith.constant 0 : i32
    %c0_i32_1 = arith.constant 0 : i32
    return %c0_i32, %c0_i32_0 : i32, i32
  }
  func.func @transform_4(%arg0: i32, %arg1: i32) -> (i32, i32) {
    %c0_i32 = arith.constant 0 : i32
    %c0_i32_0 = arith.constant 0 : i32
    %c0_i32_1 = arith.constant 0 : i32
    return %c0_i32, %c0_i32_0 : i32, i32
  }
  func.func @transform_5(%arg0: i32, %arg1: i32) -> (i32, i32) {
    %c0_i32 = arith.constant 0 : i32
    %c0_i32_0 = arith.constant 0 : i32
    %c0_i32_1 = arith.constant 0 : i32
    return %c0_i32, %c0_i32_0 : i32, i32
  }
  func.func @transform_6(%arg0: i32, %arg1: i32) -> (i32, i32) {
    %c0_i32 = arith.constant 0 : i32
    %c0_i32_0 = arith.constant 0 : i32
    %c0_i32_1 = arith.constant 0 : i32
    return %c0_i32, %c0_i32_0 : i32, i32
  }
  func.func @transform_7(%arg0: i32, %arg1: i32) -> (i32, i32) {
    %c0_i32 = arith.constant 0 : i32
    %c0_i32_0 = arith.constant 0 : i32
    return %arg0, %c0_i32 : i32, i32
  }
  func.func @transform_8(%arg0: i32, %arg1: i32) -> (i32, i32) {
    %c0_i32 = arith.constant 0 : i32
    %c0_i32_0 = arith.constant 0 : i32
    return %arg0, %c0_i32 : i32, i32
  }
}

</mosaic_0001>

<bundles_post_ra>
// kernel: tpu_custom_call.1
= control target key start
LH: loop header
LB: loop body
LE: loop exit
PB: predicated region body
PF: predicated region fallthrough
CT: control target
= control target key end

     0   :  { %s2560_s0 = inlined_call_operand.hbm [shape: bf16[32,1024], index: 0, kind: input, shape index: {}]   ;;  %s2561_s1 = inlined_call_operand.hbm [shape: bf16[1024,128], index: 1, kind: input, shape index: {}]   ;;  %s2562_s2 = inlined_call_operand.vmem [shape: f32[1,128], index: 2, kind: input, shape index: {}]   ;;  %s2563_s3 = inlined_call_operand.hbm [shape: bf16[128,128], index: 3, kind: input, shape index: {}]   ;;  %s2564_s4 = inlined_call_operand.vmem [shape: f32[1,128], index: 4, kind: input, shape index: {}]   ;;  %s2565_s5 = inlined_call_operand.hbm [shape: bf16[128,128], index: 5, kind: input, shape index: {}]   ;;  %s2566_s6 = inlined_call_operand.vmem [shape: f32[1,128], index: 6, kind: input, shape index: {}]   ;;  %s2567_s7 = inlined_call_operand.hbm [shape: f32[32,128], index: 7, kind: output, shape index: {0}]   ;;  %s2568_s8 = inlined_call_operand.hbm [shape: f32[32,128], index: 8, kind: output, shape index: {1}]  }
   0x1   :  { %2589 = sst [smem:[#allocation29_spill]] %s2560_s0 }
   0x2   :  { %2590 = sst [smem:[#allocation30_spill]] %s2562_s2 }
   0x3   :  { %2591 = sst [smem:[#allocation31_spill]] %s2563_s3 }
   0x4   :  { %2592 = sst [smem:[#allocation32_spill]] %s2564_s4 }
   0x5   :  { %2593 = sst [smem:[#allocation33_spill]] %s2565_s5 }
   0x6   :  { %2594 = sst [smem:[#allocation34_spill]] %s2566_s6 }
   0x7   :  { %2595 = sst [smem:[#allocation35_spill]] %s2567_s7 }
   0x8   :  { %2596 = sst [smem:[#allocation36_spill]] %s2568_s8 }
   0x9   :  { %14 = vsyncpa [#allocation4], 0 }
   0xa   :  { %16 = vsyncpa [#allocation4 + $0x1], 0 }
   0xb   :  { %17 = vsyncpa [#allocation7], 0 }
   0xc   :  { %19 = vsyncpa [#allocation7 + $0x1], 0 }
   0xd   :  { %20 = vsyncpa [#allocation10], 0 }
   0xe   :  { %21 = vsyncpa [#allocation5], 0 }
   0xf   :  { %23 = vsyncpa [#allocation5 + $0x1], 0 }
  0x10   :  { %24 = vsyncpa [#allocation13], 0 }
  0x11   :  { %26 = vsyncpa [#allocation13 + $0x1], 0  ;;  %s2044_s27 = smov 0   ;;  %s2046_s28 = smov 0  }
  0x12   :  { %s2048_s29 = smov 0   ;;  %s2050_s30 = smov 0  }
  0x13   :  { %s2052_s9 = smov 0   ;;  %s2054_s10 = smov 0  }
  0x14   :  { %s2056_s11 = smov 0   ;;  %s2058_s12 = smov 0  }
  0x15   :  { %s2060_s13 = smov 0   ;;  %s2062_s14 = smov 0  }
  0x16   :  { %s2064_s15 = smov 0   ;;  %s2066_s16 = smov 0  }
  0x17   :  { %s2068_s17 = smov 0   ;;  %s2070_s18 = smov 0  }
  0x18 LB: > { %2597 = sst [smem:[#allocation20_spill]] %s1929_s27  ;;  %s2111_s19 = sadd.s32 4294967295, %s1981_s18   ;;  %s1981_s18 = sphi %s2070_s18, %s32_s18   ;;  %s1977_s17 = sphi %s2068_s17, %s2649_s17   ;;  %s1973_s16 = sphi %s2066_s16, %s2659_s16   ;;  %s1969_s15 = sphi %s2064_s15, %s2647_s15   ;;  %s1965_s14 = sphi %s2062_s14, %s2658_s14   ;;  %s1961_s13 = sphi %s2060_s13, %s2657_s13   ;;  %s1957_s12 = sphi %s2058_s12, %s2656_s12   ;;  %s1953_s11 = sphi %s2056_s11, %s2655_s11   ;;  %s1949_s10 = sphi %s2054_s10, %s2654_s10   ;;  %s1945_s9 = sphi %s2052_s9, %s2653_s9   ;;  %s1941_s30 = sphi %s2050_s30, %s2652_s30   ;;  %s1937_s29 = sphi %s2048_s29, %s2651_s29   ;;  %s1933_s28 = sphi %s2046_s28, %s2650_s28   ;;  %s1929_s27 = sphi %s2044_s27, %s2646_s27  }
  0x19   : > { %2598 = sst [smem:[#allocation21_spill]] %s1933_s28  ;;  %s1259_s20 = sadd.s32 4294967294, %s1981_s18  }
  0x1a   : > { %2599 = sst [smem:[#allocation22_spill]] %s1965_s14  ;;  %p66_p0 = scmp.ne.s32.totalorder %s1957_s12, %s1953_s11 }
  0x1b   : > { %2600 = sst [smem:[#allocation23_spill]] %s1969_s15  ;;  %p2576_p1 = scmp.eq.s32.totalorder %s2111_s19, 0 }
  0x1c   : > { %2601 = sst [smem:[#allocation24_spill]] %s1977_s17  ;;  %p92_p2 = scmp.ne.s32.totalorder %s1945_s9, %s1941_s30 }
  0x1d   : > { %p2120_p3 = por %p2576_p1, %p66_p0  ;;  %p220_p4 = scmp.ne.s32.totalorder %s1937_s29, %s1933_s28 }
  0x1e   : > { %p2128_p5 = por %p92_p2, %p2576_p1  ;;  %p221_p6 = scmp.eq.s32.totalorder %s2111_s19, 3 }
  0x1f   : > { %s2602_s22 = scalar_select %p2120_p3, 1, 0 }
  0x20   : > { %s2603_s23 = scalar_select %p2128_p5, 1, 0 }
  0x21   : > { %p226_p7 = scmp.ne.s32.totalorder %s1933_s28, %s1929_s27  ;;  %p227_p8 = scmp.eq.s32.totalorder %s1259_s20, 3 }
  0x22   : > { %p2135_p9 = por %p221_p6, %p220_p4  ;;  %p1260_p10 = scmp.ge.s32.totalorder %s1981_s18, 1 }
  0x23   : > { %p2140_p11 = por %p227_p8, %p226_p7  ;;  %p260_p12 = scmp.lt.s32.totalorder %s1981_s18, 5 }
  0x24   : > { %s2604_s24 = scalar_select %p2135_p9, 1, 0 }
  0x25   : > { %s2606_s25 = scalar_select %p2140_p11, 1, 0 }
  0x26   : > { %2605 = sst [smem:[#allocation25_spill]] %s2604_s24  ;;  %p2145_p13 = pnand %p1260_p10, %p260_p12 }
  0x27   : > { %2607 = sst [smem:[#allocation26_spill]] %s2606_s25  ;;  %s1983_s30 = smov [#allocation8]  }
  0x28   : > { %s2608_s26 = scalar_select %p2145_p13, 1, 0 }
  0x29   : > { %s275_s11 = sshll.u32 %s1983_s30, 4  ;;  %p1466_p0 = pneg %p2145_p13  ;;  %s276_s11 = int_to_ptr.vmem [resolvable:$true] %s275_s11 }
  0x2a   : > { %s1984_s21 = smov [#allocation9]   ;;  %s2610_s3 = sld [smem:[#allocation31_spill]] }
  0x2b   : > { %p2153_p2 = pnand %p1466_p0, %p2576_p1  ;;  %s291_s25 = sshll.u32 %s1984_s21, 4  ;;  %s2157_s25 = int_to_ptr.vmem [resolvable:$true] %s291_s25 }
  0x2d   : > { %p1677_p6 = pneg %p2153_p2 }
  0x30   : > { %s1675_s7 = scalar_lea.hbm %s2610_s3, 1024 }
  0x31   : > { %p1676_p4 = scmp.ne.s32.totalorder %s2610_s3, %s1675_s7  ;;  %p1682_p10 = scmp.lt.u32.totalorder %s1675_s7, %s2610_s3 }
  0x33   : > { %p1678_p7 = pnand %p1677_p6, %p1676_p4 }
  0x35   : > { %p1679_p8 = pneg %p1678_p7 }
  0x37   : > { %p1684_p12 = pnand %p1682_p10, %p1679_p8 }
  0x39   : > { %1687 = shalt.err (!%p1684_p12)
}
  0x3a   : > { %s1688_s21 = scalar_lea.vmem %s276_s11, 1024  ;;  %p1696_p9 = scmp.lt.s32.totalorder %s276_s11, %s276_s11 }
  0x3b   : > { %p1689_p0 = scmp.ne.s32.totalorder %s276_s11, %s1688_s21  ;;  %p1697_p5 = scmp.lt.s32.totalorder %s1688_s21, %s1688_s21 }
  0x3d   : > { %p1691_p1 = pnand %p1689_p0, %p1677_p6  ;;  %p1698_p3 = por %p1697_p5, %p1696_p9 }
  0x3f   : > { %p1692_p11 = pneg %p1691_p1 }
  0x41   : > { %p1699_p13 = pnand %p1698_p3, %p1692_p11 }
  0x43   : > { %1702 = shalt.err (!%p1699_p13)
}
  0x44   : > { %s2581_s8 = smov 64   ;;  %s2582_s27 = smov 4  }
  0x45   : > { %1469 = dma.hbm_to_vmem [thread:$0]  (!%p2153_p2), %s2610_s3, 1024, %s276_s11, [#allocation7], %s2581_s8, %s2581_s8, %s2582_s27  }
  0x46   : > { %s2611_s5 = sld [smem:[#allocation33_spill]] }
  0x4c   : > { %s1703_s30 = scalar_lea.hbm %s2611_s5, 1024 }
  0x4d   : > { %p1704_p1 = scmp.ne.s32.totalorder %s2611_s5, %s1703_s30  ;;  %p1710_p9 = scmp.lt.u32.totalorder %s1703_s30, %s2611_s5 }
  0x4f   : > { %p1706_p3 = pnand %p1704_p1, %p1677_p6 }
  0x51   : > { %p1707_p5 = pneg %p1706_p3 }
  0x53   : > { %p1712_p11 = pnand %p1710_p9, %p1707_p5 }
  0x55   : > { %1715 = shalt.err (!%p1712_p11)
}
  0x56   : > { %s1716_s11 = scalar_lea.vmem %s2157_s25, 1024  ;;  %p1724_p8 = scmp.lt.s32.totalorder %s2157_s25, %s2157_s25 }
  0x57   : > { %p1717_p13 = scmp.ne.s32.totalorder %s2157_s25, %s1716_s11  ;;  %p1725_p10 = scmp.lt.s32.totalorder %s1716_s11, %s1716_s11 }
  0x59   : > { %p1719_p4 = pnand %p1717_p13, %p1677_p6  ;;  %p1726_p12 = por %p1725_p10, %p1724_p8 }
  0x5b   : > { %p1720_p7 = pneg %p1719_p4 }
  0x5d   : > { %p1727_p0 = pnand %p1726_p12, %p1720_p7 }
  0x5f   : > { %1730 = shalt.err (!%p1727_p0)
}
  0x60   : > { %1472 = dma.hbm_to_vmem [thread:$0]  (!%p2153_p2), %s2611_s5, 1024, %s2157_s25, [#allocation10], %s2581_s8, %s2581_s8, %s2582_s27  }
  0x61   : > { %s41_s14 = sadd.s32 1, %s1973_s16  ;;  %s44_s20 = sadd.s32 1, %s1977_s17 }
  0x62   : > { %p42_p6 = scmp.ge.s32.totalorder %s41_s14, 2  ;;  %s53_s6 = sadd.s32 1, %s1961_s13 }
  0x63   : > { %p60_p1 = scmp.ne.s32.totalorder %s1961_s13, %s1957_s12  ;;  %p2587_p3 = scmp.eq.s32.totalorder %s1981_s18, 0 }
  0x64   : > { %s2661_s14 = smov (%p42_p6, %s41_s14), 0  ;;  %s2663_s20 = smov (!%p42_p6, %s44_s20), %s1977_s17 }
  0x65   : > { %2612 = sst [smem:[#allocation27_spill]] %s2661_s14  ;;  %s2223_s7 = ssub.s32 %s1973_s16, %s2661_s14 }
  0x66   : > { %p2227_p2 = por %p2587_p3, %p60_p1  ;;  %p46_p5 = scmp.ge.s32.totalorder %s2663_s20, 2 }
  0x67   : > { %p77_p9 = scmp.eq.s32.totalorder %s2223_s7, 0  ;;  %p2586_p11 = scmp.lt.s32.totalorder %s1981_s18, 4 }
  0x68   : > { %s308_s15 = sand.u32 1, %s1961_s13   ;;  %s2665_s20 = smov (%p46_p5, %s2663_s20), 0 }
  0x69   : > { %2614 = sst [smem:[#allocation28_spill]] %s2665_s20  ;;  %s1264_s24 = sshll.u32 %s308_s15, 5 }
  0x6a   : > { %s48_s30 = ssub.s32 %s1977_s17, %s2665_s20  ;;  %s1266_s11 = sshll.u32 %s1973_s16, 2 }
  0x6b   : > { %s50_s21 = sor.u32 %s2223_s7, %s48_s30  ;;  %p208_p13 = scmp.eq.s32.totalorder %s48_s30, 0 }
  0x6c   : > { %p51_p4 = scmp.eq.s32.totalorder %s50_s21, 0  ;;  %s2615_s2 = sadd.s32 1, %s1937_s29 }
  0x6d   : > { %s2243_s4 = scalar_select %p208_p13, %s1937_s29, %s2615_s2  }
  0x6e   : > { %s2246_s8 = scalar_select %p51_p4, %s1961_s13, %s53_s6  }
  0x6f   : > { %s1344_s27 = sshll.u32 %s1977_s17, 4  ;;  %s312_s3 = scalar_lea.vmem [#allocation3], %s1264_s24 }
  0x70   : > { %s322_s5 = sshll.u32 %s312_s3, 4  ;;  %s319_s14 = sadd.s32 %s1344_s27, %s1266_s11  ;;  %s2249_s5 = int_to_ptr.vmem [resolvable:$true] %s322_s5 }
  0x71   : > { %s1268_s28 = sshll.u32 %s319_s14, 6  ;;  %p2255_p7 = pnand %p2586_p11, %p2227_p2 }
  0x72   : > { %s2617_s0 = sld [smem:[#allocation29_spill]]  ;;  %s2264_s3 = scalar_lea.sflag [#allocation4], %s308_s15 }
  0x73   : > { %p1733_p10 = pneg %p2255_p7 }
  0x78   : > { %s2262_s6 = scalar_lea.hbm %s2617_s0, %s1268_s28  ;;  %s1736_s24 = scalar_lea.hbm %s2617_s0, 2048 }
  0x79   : > { %s1731_s27 = scalar_lea.hbm %s2262_s6, 512  ;;  %p1737_p6 = scmp.lt.u32.totalorder %s2262_s6, %s2617_s0 }
  0x7a   : > { %p1732_p8 = scmp.ne.s32.totalorder %s2262_s6, %s1731_s27  ;;  %p1738_p1 = scmp.lt.u32.totalorder %s1736_s24, %s1731_s27 }
  0x7b   : > { %p1740_p5 = scmp.lt.u32.totalorder %s1731_s27, %s2262_s6 }
  0x7c   : > { %p1734_p12 = pnand %p1733_p10, %p1732_p8  ;;  %p1739_p2 = por %p1738_p1, %p1737_p6 }
  0x7e   : > { %p1735_p0 = pneg %p1734_p12  ;;  %p1741_p13 = por %p1740_p5, %p1739_p2 }
  0x80   : > { %p1742_p4 = pnand %p1741_p13, %p1735_p0 }
  0x82   : > { %1745 = shalt.err (!%p1742_p4)
}
  0x83   : > { %s1746_s15 = scalar_lea.vmem %s2249_s5, 512  ;;  %s1987_s2 = smov [#allocation3]  }
  0x84   : > { %p1747_p8 = scmp.ne.s32.totalorder %s2249_s5, %s1746_s15  ;;  %s1751_s30 = sshll.u32 %s1987_s2, 4  ;;  %s1752_s30 = int_to_ptr.vmem [resolvable:$false] %s1751_s30 }
  0x85   : > { %s1753_s21 = scalar_lea.vmem %s1752_s30, 1024  ;;  %p1754_p3 = scmp.lt.s32.totalorder %s2249_s5, %s1752_s30 }
  0x86   : > { %p1749_p12 = pnand %p1747_p8, %p1733_p10  ;;  %p1755_p6 = scmp.lt.s32.totalorder %s1753_s21, %s1746_s15 }
  0x88   : > { %p1750_p11 = pneg %p1749_p12  ;;  %p1756_p1 = por %p1755_p6, %p1754_p3 }
  0x8a   : > { %p1757_p2 = pnand %p1756_p1, %p1750_p11 }
  0x8c   : > { %1760 = shalt.err (!%p1757_p2)
}
  0x8d   : > { %s1988_s27 = smov 512   ;;  %s1989_s14 = smov 256  }
  0x8e   : > { %s1990_s25 = smov 16   ;;  %s332_s24 = sand.u32 1, %s1981_s18  }
  0x8f   : > { %1476 = dma.hbm_to_vmem [thread:$0]  (!%p2255_p7), %s2262_s6, 512, %s2249_s5, %s2264_s3, %s1988_s27, %s1989_s14, %s1990_s25  }
  0x90   : > { %s79_s28 = sadd.s32 1, %s1949_s10  ;;  %p86_p3 = scmp.ne.s32.totalorder %s1949_s10, %s1945_s9 }
  0x91   : > { %s2299_s11 = scalar_select %p77_p9, %s1949_s10, %s79_s28  }
  0x92   : > { %p2618_p11 = scmp.eq.s32.totalorder %s1981_s18, 0  ;;  %s334_s15 = sand.u32 1, %s1949_s10  }
  0x93   : > { %s1345_s2 = sshll.u32 %s1973_s16, 12  ;;  %s1269_s30 = sshll.u32 %s334_s15, 8 }
  0x94   : > { %p88_p10 = por %p86_p3, %p2618_p11  ;;  %s2308_s17 = scalar_lea.hbm %s2561_s1, %s1345_s2 }
  0x95   : > { %p2619_p0 = scmp.lt.s32.totalorder %s1981_s18, 4  ;;  %s336_s20 = scalar_lea.vmem [#allocation6], %s1269_s30 }
  0x96   : > { %s343_s7 = sshll.u32 %s336_s20, 4  ;;  %s2318_s6 = scalar_lea.sflag [#allocation7], %s332_s24  ;;  %s2316_s7 = int_to_ptr.vmem [resolvable:$true] %s343_s7 }
  0x97   : > { %p2312_p7 = pnand %p2619_p0, %p88_p10  ;;  %s1761_s0 = scalar_lea.hbm %s2308_s17, 4096 }
  0x98   : > { %p1762_p9 = scmp.ne.s32.totalorder %s2308_s17, %s1761_s0  ;;  %s1766_s14 = scalar_lea.hbm %s2561_s1, 8192 }
  0x99   : > { %p1763_p5 = pneg %p2312_p7  ;;  %p1767_p8 = scmp.lt.u32.totalorder %s2308_s17, %s2561_s1 }
  0x9a   : > { %p1768_p12 = scmp.lt.u32.totalorder %s1766_s14, %s1761_s0  ;;  %p1770_p1 = scmp.lt.u32.totalorder %s1761_s0, %s2308_s17 }
  0x9b   : > { %p1764_p13 = pnand %p1763_p5, %p1762_p9 }
  0x9c   : > { %p1769_p6 = por %p1768_p12, %p1767_p8 }
  0x9d   : > { %p1765_p4 = pneg %p1764_p13 }
  0x9e   : > { %p1771_p2 = por %p1770_p1, %p1769_p6 }
  0xa0   : > { %p1772_p3 = pnand %p1771_p2, %p1765_p4 }
  0xa2   : > { %1775 = shalt.err (!%p1772_p3)
}
  0xa3   : > { %s1776_s24 = scalar_lea.vmem %s2316_s7, 4096  ;;  %s1991_s15 = smov [#allocation6]  }
  0xa4   : > { %p1777_p11 = scmp.ne.s32.totalorder %s2316_s7, %s1776_s24  ;;  %s1781_s2 = sshll.u32 %s1991_s15, 4  ;;  %s1782_s2 = int_to_ptr.vmem [resolvable:$false] %s1781_s2 }
  0xa5   : > { %s1783_s30 = scalar_lea.vmem %s1782_s2, 8192  ;;  %p1784_p9 = scmp.lt.s32.totalorder %s2316_s7, %s1782_s2 }
  0xa6   : > { %p1779_p10 = pnand %p1777_p11, %p1763_p5  ;;  %p1785_p13 = scmp.lt.s32.totalorder %s1783_s30, %s1776_s24 }
  0xa8   : > { %p1780_p0 = pneg %p1779_p10  ;;  %p1786_p8 = por %p1785_p13, %p1784_p9 }
  0xaa   : > { %p1787_p12 = pnand %p1786_p8, %p1780_p0 }
  0xac   : > { %1790 = shalt.err (!%p1787_p12)
}
  0xad   : > { %s2621_s21 = smov 4   ;;  %s2622_s20 = smov 64  }
  0xae   : > { %1479 = dma.hbm_to_vmem [thread:$0]  (!%p2312_p7), %s2308_s17, 4096, %s2316_s7, %s2318_s6, %s2622_s20, %s2622_s20, %s2621_s21  }
  0xaf   : > { %p2623_p5 = scmp.ne.s32.totalorder %s2608_s26, 0 }
  0xb0   : > { %s357_s0 = sand.u32 (!%p2623_p5), 1, %s1957_s12   ;;  %p2624_p4 = scmp.ne.s32.totalorder (!%p2623_p5), %s2602_s22, 0 }
  0xb1   : > { %355 = sbr.rel (%p2623_p5) target bundleno = 1133 (0x46d), region = 48  ;;  %s1273_s3 = sshll.u32 (!%p2623_p5), %s357_s0, 5 }
  0xb2   : > { %s358_s27 = scalar_lea.sflag (!%p2623_p5), [#allocation4], %s357_s0  ;;  %s2352_s14 = scalar_lea.vmem (!%p2623_p5), [#allocation3], %s1273_s3 }
  0xb8   : > { %1904 = dma.done.wait (%p2624_p4), %s358_s27, 512  }
  0xb9   : > { %1906 = vsyncadd (%p2624_p4), %s358_s27, 4294966784  ;;  %s366_s5 = sand.u32 1, %s2111_s19   ;;  %s368_s17 = sand.u32 1, %s1945_s9  }
  0xba   : > { %s1274_s7 = sshll.u32 %s368_s17, 8  ;;  %s367_s26 = scalar_lea.sflag [#allocation7], %s366_s5 }
  0xbb   : > { %s2360_s6 = scalar_lea.vmem [#allocation6], %s1274_s7  ;;  %p2625_p7 = scmp.ne.s32.totalorder %s2603_s23, 0 }
  0xbd   : > { %1908 = dma.done.wait (%p2625_p7), %s367_s26, 4096  }
  0xbe   : > { %1910 = vsyncadd (%p2625_p7), %s367_s26, 4294963200  ;;  %p2626_p6 = scmp.eq.s32.totalorder %s2111_s19, 0 }
  0xc0   : > { %1912 = dma.done.wait (%p2626_p6), [#allocation7], 1024   ;;  %p2627_p1 = pmov %p2626_p6 }
  0xc2   : > { %1914 = vsyncadd (%p2627_p1), [#allocation7], 4294966272  ;;  %p2628_p2 = pmov %p2627_p1 }
  0xc3   : > { %p2629_p3 = pmov %p2627_p1 }
  0xc4   : > { %1916 = dma.done.wait (%p2628_p2), [#allocation10], 1024  }
  0xc5   : > { %1918 = vsyncadd (%p2629_p3), [#allocation10], 4294966272  ;;  %s2630_s22 = sld [smem:[#allocation21_spill]]  ;;  %s2631_s15 = sld [smem:[#allocation22_spill]] }
  0xcb   : > { %s2375_s25 = sand.u32 1, %s2630_s22   ;;  %p1279_p11 = scmp.ne.s32.totalorder %s2631_s15, 0 }
  0xcc   : > { %s1277_s28 = sshll.u32 %s2375_s25, 4  ;;  %v1992_v0 = vmov (!%p1279_p11), 0.0  }
  0xcd   : > { %s2378_s24 = scalar_lea.vmem [#allocation11], %s1277_s28  ;;  %s2380_s23 = scalar_lea.vmem [#allocation12], %s1277_s28  ;;  %431 = vst [vmem:[#allocation2] sm:$0xff] (!%p1279_p11), %v1992_v0  ;;  %432 = vst [vmem:[#allocation2 + $0x8] sm:$0xff] (!%p1279_p11), %v1992_v0 }
  0xce   : > { %430 = sbr.rel (%p1279_p11) target bundleno = 213 (0xd5), region = 68 }
  0xd5 PF: > { %v1617_v1 = vld [vmem:[%s2360_s6 + $0x40] sm:$0xff]   ;;  %v1621_v5 = vld [vmem:[%s2360_s6 + $0x48] sm:$0xff]   ;;  %v1625_v9 = vld [vmem:[%s2360_s6 + $0x50] sm:$0xff]   ;;  %s2632_s19 = sld [smem:[#allocation22_spill]] }
  0xd6   : > { %v1618_v2 = vld [vmem:[%s2360_s6 + $0xc0] sm:$0xff]   ;;  %1348 = vmatprep.subr.bf16.mxu0 %v1617_v1  ;;  %v1622_v6 = vld [vmem:[%s2360_s6 + $0xc8] sm:$0xff]   ;;  %v1626_v10 = vld [vmem:[%s2360_s6 + $0xd0] sm:$0xff]  }
  0xd7   : > { %v1619_v3 = vld [vmem:[%s2360_s6] sm:$0xff]   ;;  %1370 = vmatprep.subr.bf16.mxu1 %v1618_v2  ;;  %v1623_v7 = vld [vmem:[%s2360_s6 + $0x8] sm:$0xff]   ;;  %v1627_v11 = vld [vmem:[%s2360_s6 + $0x10] sm:$0xff]  }
  0xd8   : > { %v1620_v4 = vld [vmem:[%s2360_s6 + $0x80] sm:$0xff]   ;;  %1349 = vmatpush3.bf16.msra.mxu0 %v1619_v3  ;;  %v1624_v8 = vld [vmem:[%s2360_s6 + $0x88] sm:$0xff]   ;;  %v1628_v12 = vld [vmem:[%s2360_s6 + $0x90] sm:$0xff]  }
  0xd9   : > { %1371 = vmatpush3.bf16.msra.mxu1 %v1620_v4  ;;  %1350 = vmatprep.subr.bf16.mxu0 %v1621_v5  ;;  %v1629_v13 = vld [vmem:[%s2360_s6 + $0x58] sm:$0xff]   ;;  %v1633_v17 = vld [vmem:[%s2360_s6 + $0x60] sm:$0xff]   ;;  %v1637_v21 = vld [vmem:[%s2360_s6 + $0x68] sm:$0xff]  }
  0xda   : > { %1372 = vmatprep.subr.bf16.mxu1 %v1622_v6  ;;  %v1630_v14 = vld [vmem:[%s2360_s6 + $0xd8] sm:$0xff]   ;;  %v1634_v18 = vld [vmem:[%s2360_s6 + $0xe0] sm:$0xff]   ;;  %v1638_v22 = vld [vmem:[%s2360_s6 + $0xe8] sm:$0xff]  }
  0xdb   : > { %v1631_v15 = vld [vmem:[%s2360_s6 + $0x18] sm:$0xff]   ;;  %v1635_v19 = vld [vmem:[%s2360_s6 + $0x20] sm:$0xff]   ;;  %v1639_v23 = vld [vmem:[%s2360_s6 + $0x28] sm:$0xff]   ;;  %p1316_p10 = scmp.ne.s32.totalorder %s2632_s19, 1 }
  0xdc   : > { %1351 = vmatpush3.bf16.msra.mxu0 %v1623_v7  ;;  %v1632_v16 = vld [vmem:[%s2360_s6 + $0x98] sm:$0xff]   ;;  %v1636_v20 = vld [vmem:[%s2360_s6 + $0xa0] sm:$0xff]   ;;  %v1640_v24 = vld [vmem:[%s2360_s6 + $0xa8] sm:$0xff]   ;;  %v1993_v56 = vmov (!%p1316_p10), 0.0   ;;  %vm1994_vm0 = vmmov (!%p1316_p10), 0   ;;  %s2633_s21 = sld [smem:[#allocation30_spill]] (!%p1316_p10) }
  0xdd   : > { %1373 = vmatpush3.bf16.msra.mxu1 %v1624_v8  ;;  %1352 = vmatprep.subr.bf16.mxu0 %v1625_v9  ;;  %v1641_v25 = vld [vmem:[%s2360_s6 + $0x70] sm:$0xff]   ;;  %v1645_v29 = vld [vmem:[%s2360_s6 + $0x78] sm:$0xff]   ;;  %v1655_v55 = vld [vmem:[#allocation8] sm:$0xff] (!%p1316_p10)   ;;  %s2634_s3 = sld [smem:[#allocation32_spill]] (!%p1316_p10)  ;;  %s2635_s5 = sld [smem:[#allocation34_spill]] (!%p1316_p10) }
  0xde   : > { %1374 = vmatprep.subr.bf16.mxu1 %v1626_v10  ;;  %v1642_v26 = vld [vmem:[%s2360_s6 + $0xf0] sm:$0xff]   ;;  %v1646_v30 = vld [vmem:[%s2360_s6 + $0xf8] sm:$0xff]   ;;  %v1656_v57 = vld [vmem:[#allocation8 + $0x8] sm:$0xff] (!%p1316_p10)  }
  0xdf   : > { %v1643_v27 = vld [vmem:[%s2360_s6 + $0x30] sm:$0xff]   ;;  %v1647_v31 = vld [vmem:[%s2360_s6 + $0x38] sm:$0xff]   ;;  %v1663_v1 = vld [vmem:[#allocation9] sm:$0xff] (!%p1316_p10)  }
  0xe0   : > { %1353 = vmatpush3.bf16.msra.mxu0 %v1627_v11  ;;  %v1644_v28 = vld [vmem:[%s2360_s6 + $0xb0] sm:$0xff]   ;;  %v1648_v32 = vld [vmem:[%s2360_s6 + $0xb8] sm:$0xff]   ;;  %v1664_v2 = vld [vmem:[#allocation9 + $0x8] sm:$0xff] (!%p1316_p10)  }
  0xe1   : > { %1375 = vmatpush3.bf16.msra.mxu1 %v1628_v12  ;;  %1354 = vmatprep.subr.bf16.mxu0 %v1629_v13  ;;  %v1649_v33 = vld [vmem:[%s2352_s14] ss:$16 sps:$4 sm:$0xff]   ;;  %v1651_v34 = vld [vmem:[%s2352_s14 + $0x4] ss:$16 sps:$4 sm:$0xff]   ;;  %v1652_v35 = vld [vmem:[%s2352_s14 + $0x8] ss:$16 sps:$4 sm:$0xff]  }
  0xe2   : > { %1376 = vmatprep.subr.bf16.mxu1 %v1630_v14  ;;  %v1654_v36 = vld [vmem:[%s2352_s14 + $0xc] ss:$16 sps:$4 sm:$0xff]   ;;  %747 = vmatprep.mubr.bf16.mxu0 %v1651_v34  ;;  %v433_v46 = vld [vmem:[#allocation2] sm:$0xff]  ;;  %v1659_v5 = vld [vmem:[#allocation8 + $0x20] sm:$0xff] (!%p1316_p10)  }
  0xe3   : > { %788 = vmatprep.mubr.bf16.mxu1 %v1654_v36  ;;  %v434_v51 = vld [vmem:[#allocation2 + $0x8] sm:$0xff]  ;;  %v1657_v58 = vld [vmem:[#allocation8 + $0x10] sm:$0xff] (!%p1316_p10)   ;;  %v1660_v7 = vld [vmem:[#allocation8 + $0x28] sm:$0xff] (!%p1316_p10)  }
  0xe4   : > { %1355 = vmatpush3.bf16.msra.mxu0 %v1631_v15  ;;  %v1658_v59 = vld [vmem:[#allocation8 + $0x18] sm:$0xff] (!%p1316_p10)   ;;  %v1317_v62 = vld [vmem:[%s2633_s21] ss:$0 sm:$0xff] (!%p1316_p10)  ;;  %v1667_v10 = vld [vmem:[#allocation9 + $0x20] sm:$0xff] (!%p1316_p10)  }
  0xe5   : > { %1377 = vmatpush3.bf16.msra.mxu1 %v1632_v16  ;;  %1356 = vmatprep.subr.bf16.mxu0 %v1633_v17  ;;  %v1665_v6 = vld [vmem:[#allocation9 + $0x10] sm:$0xff] (!%p1316_p10)   ;;  %v1666_v8 = vld [vmem:[#allocation9 + $0x18] sm:$0xff] (!%p1316_p10)   ;;  %v1668_v12 = vld [vmem:[#allocation9 + $0x28] sm:$0xff] (!%p1316_p10)  }
  0xe6   : > { %1378 = vmatprep.subr.bf16.mxu1 %v1634_v18  ;;  %v1661_v9 = vld [vmem:[#allocation8 + $0x30] sm:$0xff] (!%p1316_p10)   ;;  %v1662_v11 = vld [vmem:[#allocation8 + $0x38] sm:$0xff] (!%p1316_p10)  }
  0xe7   : > { %v1669_v14 = vld [vmem:[#allocation9 + $0x30] sm:$0xff] (!%p1316_p10)   ;;  %v1670_v15 = vld [vmem:[#allocation9 + $0x38] sm:$0xff] (!%p1316_p10)  }
  0xe8   : > { %1357 = vmatpush3.bf16.msra.mxu0 %v1635_v19  ;;  %v1318_v16 = vld [vmem:[%s2634_s3] ss:$0 sm:$0xff] (!%p1316_p10) }
  0xe9   : > { %1379 = vmatpush3.bf16.msra.mxu1 %v1636_v20  ;;  %1358 = vmatprep.subr.bf16.mxu0 %v1637_v21 }
  0xea   : > { %1380 = vmatprep.subr.bf16.mxu1 %v1638_v22 }
  0xec   : > { %1359 = vmatpush3.bf16.msra.mxu0 %v1639_v23 }
  0xed   : > { %1381 = vmatpush3.bf16.msra.mxu1 %v1640_v24  ;;  %1360 = vmatprep.subr.bf16.mxu0 %v1641_v25 }
  0xee   : > { %1382 = vmatprep.subr.bf16.mxu1 %v1642_v26  ;;  %v1327_v26 = vld [vmem:[%s2635_s5] ss:$0 sm:$0xff] (!%p1316_p10) }
  0xf0   : > { %1361 = vmatpush3.bf16.msra.mxu0 %v1643_v27 }
  0xf1   : > { %1383 = vmatpush3.bf16.msra.mxu1 %v1644_v28  ;;  %1362 = vmatprep.subr.bf16.mxu0 %v1645_v29 }
  0xf2   : > { %1384 = vmatprep.subr.bf16.mxu1 %v1646_v30 }
  0xf4   : > { %1363 = vmatpush3.bf16.msra.mxu0 %v1647_v31 }
  0xf5   : > { %1385 = vmatpush3.bf16.msra.mxu1 %v1648_v32  ;;  %1410 = vmatprep.subr.bf16.mxu0 (!%p1316_p10), %v1993_v56 }
  0xf6   : > { %1430 = vmatprep.subr.bf16.mxu1 (!%p1316_p10), %v1993_v56 }
  0xf7   : > { %748 = vmatmul.mubr.bf16.vlgmr.msra.gmra.mrb[0].mxu0 %v1649_v33 }
  0xf8   : > { %789 = vmatmul.mubr.bf16.vlgmr.msra.gmra.mrb[0].mxu1 %v1652_v35  ;;  %1411 = vmatpush3.bf16.msra.mxu0 (!%p1316_p10), %v1655_v55 }
  0xf9   : > { %1426 = vmatprep.mubr.msk.bf16.mxu0 (!%p1316_p10), %vm1994_vm0, %v1993_v56  ;;  %1412 = vmatprep.subr.bf16.mxu0 (!%p1316_p10), %v1993_v56 }
  0xfa   : > { %1446 = vmatprep.mubr.msk.bf16.mxu1 (!%p1316_p10), %vm1994_vm0, %v1993_v56  ;;  %1431 = vmatpush3.bf16.msra.mxu1 (!%p1316_p10), %v1663_v1 }
  0xfb   : > { %1432 = vmatprep.subr.bf16.mxu1 (!%p1316_p10), %v1993_v56 }
  0xfc   : > { %1413 = vmatpush3.bf16.msra.mxu0 (!%p1316_p10), %v1656_v57 }
  0xfd   : > { %1414 = vmatprep.subr.bf16.mxu0 (!%p1316_p10), %v1993_v56 }
  0xfe   : > { %1433 = vmatpush3.bf16.msra.mxu1 (!%p1316_p10), %v1664_v2 }
  0xff   : > { %1434 = vmatprep.subr.bf16.mxu1 (!%p1316_p10), %v1993_v56 }
 0x100   : > { %1415 = vmatpush3.bf16.msra.mxu0 (!%p1316_p10), %v1657_v58 }
 0x101   : > { %1416 = vmatprep.subr.bf16.mxu0 (!%p1316_p10), %v1993_v56 }
 0x102   : > { %1435 = vmatpush3.bf16.msra.mxu1 (!%p1316_p10), %v1665_v6 }
 0x103   : > { %1436 = vmatprep.subr.bf16.mxu1 (!%p1316_p10), %v1993_v56 }
 0x104   : > { %1417 = vmatpush3.bf16.msra.mxu0 (!%p1316_p10), %v1658_v59 }
 0x105   : > { %1418 = vmatprep.subr.bf16.mxu0 (!%p1316_p10), %v1993_v56 }
 0x106   : > { %1437 = vmatpush3.bf16.msra.mxu1 (!%p1316_p10), %v1666_v8 }
 0x107   : > { %1438 = vmatprep.subr.bf16.mxu1 (!%p1316_p10), %v1993_v56 }
 0x108   : > { %1419 = vmatpush3.bf16.msra.mxu0 (!%p1316_p10), %v1659_v5 }
 0x109   : > { %1420 = vmatprep.subr.bf16.mxu0 (!%p1316_p10), %v1993_v56 }
 0x10a   : > { %1439 = vmatpush3.bf16.msra.mxu1 (!%p1316_p10), %v1667_v10 }
 0x10b   : > { %1440 = vmatprep.subr.bf16.mxu1 (!%p1316_p10), %v1993_v56 }
 0x10c   : > { %1421 = vmatpush3.bf16.msra.mxu0 (!%p1316_p10), %v1660_v7 }
 0x10d   : > { %1422 = vmatprep.subr.bf16.mxu0 (!%p1316_p10), %v1993_v56 }
 0x10e   : > { %1441 = vmatpush3.bf16.msra.mxu1 (!%p1316_p10), %v1668_v12 }
 0x10f   : > { %1442 = vmatprep.subr.bf16.mxu1 (!%p1316_p10), %v1993_v56 }
 0x110   : > { %1423 = vmatpush3.bf16.msra.mxu0 (!%p1316_p10), %v1661_v9 }
 0x111   : > { %1424 = vmatprep.subr.bf16.mxu0 (!%p1316_p10), %v1993_v56 }
 0x112   : > { %1443 = vmatpush3.bf16.msra.mxu1 (!%p1316_p10), %v1669_v14 }
 0x113   : > { %1444 = vmatprep.subr.bf16.mxu1 (!%p1316_p10), %v1993_v56 }
 0x114   : > { %1425 = vmatpush3.bf16.msra.mxu0 (!%p1316_p10), %v1662_v11 }
 0x116   : > { %1445 = vmatpush3.bf16.msra.mxu1 (!%p1316_p10), %v1670_v15 }
 0x1ca   : > { %v1364_v37 = vpop.f32.mrb[0].mxu0 }
 0x1cb   : > { %v1386_v38 = vpop.f32.mrb[0].mxu1  ;;  %v1365_v39 = vpop.f32.mrb[1].mxu0 }
 0x1cc   : > { %v1366_v40 = vadd.f32 %v1365_v39, %v1364_v37  ;;  %v1387_v41 = vpop.f32.mrb[1].mxu1  ;;  %v1367_v42 = vpop.f32.mrb[2].mxu0 }
 0x1cd   : > { %v1388_v43 = vadd.f32 %v1387_v41, %v1386_v38  ;;  %v1389_v44 = vpop.f32.mrb[2].mxu1  ;;  %v1368_v45 = vpop.f32.mrb[3].mxu0 }
 0x1ce   : > { %v1369_v47 = vadd.f32 %v1368_v45, %v1367_v42  ;;  %v1390_v48 = vpop.f32.mrb[3].mxu1 }
 0x1cf   : > { %v791_v49 = vadd.f32 %v1388_v43, %v1366_v40  ;;  %v1391_v50 = vadd.f32 %v1390_v48, %v1389_v44  ;;  %804 = sbr.rel (%p1316_p10) target bundleno = 1081 (0x439), region = 72 }
 0x1d1   : > { %v797_v52 = vadd.f32 %v791_v49, %v433_v46  ;;  %v794_v53 = vadd.f32 %v1391_v50, %v1369_v47 }
 0x1d3   : > { %799 = vst [vmem:[#allocation2] sm:$0xff] %v797_v52  ;;  %v798_v54 = vadd.f32 %v794_v53, %v434_v51 }
 0x1d5   : > { %800 = vst [vmem:[#allocation2 + $0x8] sm:$0xff] %v798_v54 }
 0x1da   : > { %v805_v60 = vld [vmem:[#allocation2] sm:$0xff] }
 0x1db   : > { %v814_v63 = vadd.f32 %v1317_v62, %v805_v60 }
 0x1dc   : > { %v806_v61 = vld [vmem:[#allocation2 + $0x8] sm:$0xff] }
 0x1dd   : > { %v815_v0 = vadd.f32 %v1317_v62, %v806_v61  ;;  %v816_v3 = vmax.f32 %v814_v63, 0.0 }
 0x1df   : > { %v817_v4 = vmax.f32 %v815_v0, 0.0  ;;  %818 = vst [vmem:[%s2378_s24] sm:$0xff] %v816_v3 }
 0x1e1   : > { %819 = vst [vmem:[%s2378_s24 + $0x8] sm:$0xff] %v817_v4  ;;  %v820_v13 = vpack.c.bf16 %v817_v4, %v816_v3 }
 0x1e3   : > { %1427 = vmatmul.mubr.bf16.vlgmr.msra.gmra.mrb[0].mxu0 %v820_v13 }
 0x2b6   : > { %v926_v17 = vpop.f32.mrb[0].mxu0 }
 0x2b7   : > { %v927_v18 = vadd.f32 %v1318_v16, %v926_v17  ;;  %v1428_v19 = vpop.f32.mrb[1].mxu0 }
 0x2b8   : > { %v929_v20 = vpop.f32.mrb[2].mxu0 }
 0x2b9   : > { %v930_v21 = vadd.f32 %v1318_v16, %v929_v20  ;;  %v1429_v22 = vpop.f32.mrb[3].mxu0  ;;  %v933_v23 = vmax.f32 %v927_v18, 0.0 }
 0x2bb   : > { %v934_v24 = vmax.f32 %v930_v21, 0.0 }
 0x2bd   : > { %v935_v25 = vpack.c.bf16 %v934_v24, %v933_v23 }
 0x2bf   : > { %1447 = vmatmul.mubr.bf16.vlgmr.msra.gmra.mrb[0].mxu1 %v935_v25 }
 0x392   : > { %v1041_v27 = vpop.f32.mrb[0].mxu1 }
 0x393   : > { %v1042_v28 = vadd.f32 %v1327_v26, %v1041_v27  ;;  %v1448_v29 = vpop.f32.mrb[1].mxu1 }
 0x394   : > { %v1044_v30 = vpop.f32.mrb[2].mxu1 }
 0x395   : > { %v1045_v31 = vadd.f32 %v1327_v26, %v1044_v30  ;;  %v1449_v32 = vpop.f32.mrb[3].mxu1  ;;  %v1048_v33 = vmul.f32 %v1042_v28, %v1042_v28 }
 0x397   : > { %1050 = vadd.xlane.f32.xlu0 %v1048_v33  ;;  %v1049_v34 = vmul.f32 %v1045_v31, %v1045_v31 }
 0x39b   : > { %1052 = vadd.xlane.f32.xlu0 %v1049_v34 }
 0x424   : > { %v1051_v35 = vpop.xlane.xlu0 %1050 }
 0x425   : > { %v1054_v36 = vmax.f32 %v1051_v35, 1e-24 }
 0x427   : > { %1671 = vrsqrt.f32 %v1054_v36 }
 0x428   : > { %v1053_v37 = vpop.xlane.xlu0 %1052 }
 0x429   : > { %v1055_v38 = vmax.f32 %v1053_v37, 1e-24 }
 0x42b   : > { %1673 = vrsqrt.f32 %v1055_v38 }
 0x431   : > { %v1672_v39 = vpop.eup %1671 }
 0x432   : > { %v1058_v40 = vmul.f32 %v1672_v39, %v1042_v28 }
 0x434   : > { %1060 = vst [vmem:[%s2380_s23] sm:$0xff] %v1058_v40 }
 0x435   : > { %v1674_v41 = vpop.eup %1673 }
 0x436   : > { %v1059_v42 = vmul.f32 %v1674_v41, %v1045_v31 }
 0x438   : > { %1061 = vst [vmem:[%s2380_s23 + $0x8] sm:$0xff] %v1059_v42 }
 0x439 PF: > { %s2636_s17 = sld [smem:[#allocation23_spill]]  ;;  %s2637_s7 = sld [smem:[#allocation25_spill]] }
 0x43a   : > { %s2638_s28 = sld [smem:[#allocation35_spill]]  ;;  %s1081_s2 = sshll.u32 %s2378_s24, 4  ;;  %s2442_s2 = int_to_ptr.vmem [resolvable:$true] %s1081_s2 }
 0x43b   : > { %s1063_s30 = scalar_lea.sflag [#allocation5], %s2375_s25  ;;  %s1791_s21 = scalar_lea.vmem %s2442_s2, 256 }
 0x43c   : > { %p1792_p0 = scmp.ne.s32.totalorder %s2442_s2, %s1791_s21  ;;  %s1995_s20 = smov [#allocation11]  }
 0x43d   : > { %s1795_s0 = sshll.u32 %s1995_s20, 4  ;;  %s1796_s0 = int_to_ptr.vmem [resolvable:$false] %s1795_s0 }
 0x43e   : > { %s1797_s3 = scalar_lea.vmem %s1796_s0, 512  ;;  %p1798_p12 = scmp.lt.s32.totalorder %s2442_s2, %s1796_s0 }
 0x43f   : > { %s1346_s26 = sshll.u32 %s2636_s17, 8  ;;  %p2640_p9 = scmp.ne.s32.totalorder %s2637_s7, 0 }
 0x440   : > { %s2639_s19 = smov %s2638_s28  ;;  %s2439_s15 = scalar_lea.hbm %s2638_s28, %s1346_s26 }
 0x441   : > { %p1793_p13 = pnand %p1792_p0, %p2640_p9  ;;  %p1799_p5 = scmp.lt.s32.totalorder %s1797_s3, %s1791_s21 }
 0x443   : > { %p1794_p8 = pneg %p1793_p13  ;;  %p1800_p4 = por %p1799_p5, %p1798_p12 }
 0x445   : > { %p1801_p7 = pnand %p1800_p4, %p1794_p8 }
 0x447   : > { %1804 = shalt.err (!%p1801_p7)
}
 0x448   : > { %s1805_s24 = scalar_lea.hbm %s2439_s15, 256  ;;  %s1809_s5 = scalar_lea.hbm %s2639_s19, 512 }
 0x449   : > { %p1806_p6 = scmp.ne.s32.totalorder %s2439_s15, %s1805_s24  ;;  %p1810_p3 = scmp.lt.u32.totalorder %s2439_s15, %s2639_s19 }
 0x44a   : > { %p1811_p11 = scmp.lt.u32.totalorder %s1809_s5, %s1805_s24  ;;  %p1813_p0 = scmp.lt.u32.totalorder %s1805_s24, %s2439_s15 }
 0x44b   : > { %p1807_p1 = pnand %p1806_p6, %p2640_p9 }
 0x44c   : > { %p1812_p10 = por %p1811_p11, %p1810_p3 }
 0x44d   : > { %p1808_p2 = pneg %p1807_p1 }
 0x44e   : > { %p1814_p13 = por %p1813_p0, %p1812_p10 }
 0x450   : > { %p1815_p8 = pnand %p1814_p13, %p1808_p2 }
 0x452   : > { %1818 = shalt.err (!%p1815_p8)
}
 0x453   : > { %s1996_s28 = smov 128   ;;  %s1997_s21 = smov 8  }
 0x454   : > { %1462 = dma.vmem_to_hbm [thread:$0]  (%p2640_p9), %s2442_s2, 256, %s2439_s15, %s1063_s30, %s1996_s28, %s1996_s28, %s1997_s21  }
 0x455   : > { %s2641_s3 = sld [smem:[#allocation36_spill]]  ;;  %s1097_s27 = sshll.u32 %s2380_s23, 4  ;;  %s2479_s27 = int_to_ptr.vmem [resolvable:$true] %s1097_s27 }
 0x456   : > { %s1068_s14 = scalar_lea.sflag [#allocation13], %s2375_s25  ;;  %s1819_s5 = scalar_lea.vmem %s2479_s27, 256 }
 0x457   : > { %p1820_p12 = scmp.ne.s32.totalorder %s2479_s27, %s1819_s5  ;;  %s1998_s6 = smov [#allocation12]  }
 0x458   : > { %s1823_s15 = sshll.u32 %s1998_s6, 4  ;;  %s1824_s15 = int_to_ptr.vmem [resolvable:$false] %s1823_s15 }
 0x459   : > { %p1821_p5 = pnand %p1820_p12, %p2640_p9  ;;  %s1825_s17 = scalar_lea.vmem %s1824_s15, 512 }
 0x45a   : > { %p1826_p7 = scmp.lt.s32.totalorder %s2479_s27, %s1824_s15  ;;  %p1827_p6 = scmp.lt.s32.totalorder %s1825_s17, %s1819_s5 }
 0x45b   : > { %s2476_s24 = scalar_lea.hbm %s2641_s3, %s1346_s26  ;;  %p1822_p4 = pneg %p1821_p5 }
 0x45c   : > { %p1828_p1 = por %p1827_p6, %p1826_p7 }
 0x45e   : > { %p1829_p2 = pnand %p1828_p1, %p1822_p4 }
 0x460   : > { %1832 = shalt.err (!%p1829_p2)
}
 0x461   : > { %s1833_s23 = scalar_lea.hbm %s2476_s24, 256  ;;  %s1837_s30 = scalar_lea.hbm %s2641_s3, 512 }
 0x462   : > { %p1834_p3 = scmp.ne.s32.totalorder %s2476_s24, %s1833_s23  ;;  %p1838_p0 = scmp.lt.u32.totalorder %s2476_s24, %s2641_s3 }
 0x463   : > { %p1839_p13 = scmp.lt.u32.totalorder %s1837_s30, %s1833_s23  ;;  %p1841_p12 = scmp.lt.u32.totalorder %s1833_s23, %s2476_s24 }
 0x464   : > { %p1835_p11 = pnand %p1834_p3, %p2640_p9 }
 0x465   : > { %p1840_p8 = por %p1839_p13, %p1838_p0 }
 0x466   : > { %p1836_p10 = pneg %p1835_p11 }
 0x467   : > { %p1842_p5 = por %p1841_p12, %p1840_p8 }
 0x469   : > { %p1843_p4 = pnand %p1842_p5, %p1836_p10 }
 0x46b   : > { %1846 = shalt.err (!%p1843_p4)
}
 0x46c   : > { %1463 = dma.vmem_to_hbm [thread:$0]  (%p2640_p9), %s2479_s27, 256, %s2476_s24, %s1068_s14, %s1996_s28, %s1996_s28, %s1997_s21  }
 0x46d PF: > { %s2642_s0 = sld [smem:[#allocation20_spill]]  ;;  %s2643_s5 = sld [smem:[#allocation26_spill]] }
 0x46e   : > { %p1492_p7 = scmp.ge.s32.totalorder %s1981_s18, 2 }
 0x473   : > { %s1112_s6 = sand.u32 1, %s2642_s0   ;;  %p2644_p6 = scmp.ne.s32.totalorder %s2643_s5, 0 }
 0x474   : > { %s1113_s15 = scalar_lea.sflag [#allocation5], %s1112_s6 }
 0x475   : > { %p1481_p1 = pnand %p1492_p7, %p2644_p6 }
 0x477   : > { %1920 = dma.done.wait (!%p1481_p1), %s1113_s15, 256  }
 0x478   : > { %1922 = vsyncadd (!%p1481_p1), %s1113_s15, 4294967040  ;;  %s1122_s7 = scalar_lea.sflag [#allocation13], %s1112_s6 }
 0x479   : > { %1924 = dma.done.wait (!%p1481_p1), %s1122_s7, 256  }
 0x47a   : > { %1926 = vsyncadd (!%p1481_p1), %s1122_s7, 4294967040  ;;  %s32_s18 = sadd.s32 1, %s1981_s18   ;;  %s2646_s27 = sld [smem:[#allocation21_spill]] }
 0x47b   : > { %p2513_p2 = scmp.ge.s32.totalorder %s32_s18, 6   ;;  %s2647_s15 = sld [smem:[#allocation24_spill]] }
 0x47c   : > { %s2648_s21 = sld [smem:[#allocation27_spill]]  ;;  %s2649_s17 = sld [smem:[#allocation28_spill]] }
 0x47d   : > { %s2650_s28 = smov %s1937_s29  ;;  %s2651_s29 = smov %s2243_s4 }
 0x47e   : > { %s2652_s30 = smov %s1945_s9  ;;  %s2653_s9 = smov %s1949_s10 }
 0x47f   : > { %s2654_s10 = smov %s2299_s11  ;;  %s2655_s11 = smov %s1957_s12 }
 0x480   : > { %s2656_s12 = smov %s1961_s13  ;;  %s2657_s13 = smov %s2246_s8 }
 0x481   : > { %s2658_s14 = smov %s1973_s16  ;;  %31 = sbr.rel (!%p2513_p2) target bundleno = 24 (0x18), region = 139 }
 0x482   : > { %s2659_s16 = smov %s2648_s21 }
 0x488   :  { %1127 = vsyncpa [#allocation4], 1 }
 0x489   :  { %1129 = vsyncpa [#allocation4 + $0x1], 1 }
 0x48a   :  { %1130 = vsyncpa [#allocation7], 1 }
 0x48b   :  { %1132 = vsyncpa [#allocation7 + $0x1], 1 }
 0x48c   :  { %1133 = vsyncpa [#allocation10], 1 }
 0x48d   :  { %1134 = vsyncpa [#allocation5], 1 }
 0x48e   :  { %1136 = vsyncpa [#allocation5 + $0x1], 1 }
 0x48f   :  { %1137 = vsyncpa [#allocation13], 1 }
 0x490   :  { %1139 = vsyncpa [#allocation13 + $0x1], 1 }

</bundles_post_ra>
